<compile_context>
chip_gen: v6e
topology: v6e:2x2x1
jax: 0.10.0
libtpu: 0.0.40
codegen_flags: <defaults>
</compile_context>

<pallas_src>
import functools

import jax
import jax.numpy as jnp
from jax.experimental import pallas as pl
from jax.experimental.pallas import tpu as pltpu


def _round_up(a, b):
    return (a + b - 1) // b * b


def _experts_kernel(idx_ref, x_ref, w_ref, b_ref, o_ref, *, num_classes,
                    regressive):
    # idx_ref: SMEM scalar-prefetch ref (drives expert selection in index_maps).
    # x_ref:   (TB, Fp)  VMEM, storage dtype
    # w_ref:   (Cp, Fp)  VMEM, storage dtype  (selected expert, squeezed)
    # b_ref:   (1,  Cp)  VMEM                 (selected expert, squeezed)
    # o_ref:   (TB, Cp)  VMEM
    x = x_ref[...]
    w = w_ref[...]
    b = b_ref[...].astype(jnp.float32)

    # Linear: contract fdim of x against fdim of w (no explicit transpose);
    # MXU runs in the operand storage dtype with f32 accumulation.
    logits = jax.lax.dot_general(
        x, w,
        dimension_numbers=(((1,), (1,)), ((), ())),
        preferred_element_type=jnp.float32,
    ) + b                                               # (TB, Cp) f32

    padded = logits.shape[-1] != num_classes

    if regressive:
        out = jax.nn.sigmoid(logits)                    # padded lanes sliced off in wrapper
    else:
        if padded:
            lane = jax.lax.broadcasted_iota(jnp.int32, logits.shape, 1)
            logits = jnp.where(lane < num_classes, logits, -jnp.inf)
        # numerically-stable softmax over the class axis (PyTorch dim=1)
        m = jnp.max(logits, axis=-1, keepdims=True)
        e = jnp.exp(logits - m)
        denom = jnp.sum(e, axis=-1, keepdims=True)
        out = e * pl.reciprocal(denom, approx=True)     # EUP vrcp, ~free

    o_ref[...] = out.astype(o_ref.dtype)


def experts_forward(i, x, weights, biases, *, regressive=False, tb=None):
    """Pallas implementation of Experts.forward(i, x).

    Args:
      i:        int (or int32 scalar array) expert index in [0, n_source)
      x:        (batch, fdim) float array
      weights:  (n_source, num_classes, fdim)   -- stacked nn.Linear weights
      biases:   (n_source, num_classes)         -- stacked nn.Linear biases
      regressive: if True use Sigmoid, else Softmax(dim=1)
      tb:       optional batch-tile override
    Returns:
      (batch, num_classes) array, softmax (or sigmoid) of the selected linear.
    """
    n_source, num_classes, fdim = weights.shape
    batch = x.shape[0]
    assert x.shape == (batch, fdim)
    assert biases.shape == (n_source, num_classes)

    # Lane/sublane + MXU alignment. In production the weight/bias padding
    # should be done once at init, not per call.
    cp = _round_up(num_classes, 128)
    fp = _round_up(fdim, 128)
    if tb is None:
        tb = min(512, _round_up(batch, 128))
    bp = _round_up(batch, tb)

    x_p = jnp.pad(x, ((0, bp - batch), (0, fp - fdim)))
    w_p = jnp.pad(weights, ((0, 0), (0, cp - num_classes), (0, fp - fdim)))
    b_p = jnp.pad(biases, ((0, 0), (0, cp - num_classes)))
    b_p = b_p.reshape(n_source, 1, cp)

    idx = jnp.asarray(i, dtype=jnp.int32).reshape((1,))

    grid_spec = pltpu.PrefetchScalarGridSpec(
        num_scalar_prefetch=1,              # expert index, prefetched to SMEM
        grid=(bp // tb,),                   # tile the batch dimension
        in_specs=[
            # x: one batch tile per grid step (double-buffered by Pallas)
            pl.BlockSpec((tb, fp), lambda g, idx_ref: (g, 0)),
            # selected expert's weight: same block every step -> VMEM-resident
            pl.BlockSpec((None, cp, fp), lambda g, idx_ref: (idx_ref[0], 0, 0)),
            # selected expert's bias: same block every step -> VMEM-resident
            pl.BlockSpec((None, 1, cp), lambda g, idx_ref: (idx_ref[0], 0, 0)),
        ],
        out_specs=pl.BlockSpec((tb, cp), lambda g, idx_ref: (g, 0)),
    )

    out_padded = pl.pallas_call(
        functools.partial(_experts_kernel, num_classes=num_classes,
                          regressive=regressive),
        grid_spec=grid_spec,
        out_shape=jax.ShapeDtypeStruct((bp, cp), x.dtype),
        compiler_params=pltpu.CompilerParams(
            # batch tiles are independent -> shard across TCs on v7x
            dimension_semantics=("parallel",),
            # headroom above the default scoped limit; still safe on v7x 64MiB
            vmem_limit_bytes=48 * 1024 * 1024,
        ),
    )(idx, x_p, w_p, b_p)

    # TODO(synk): for fdim large enough to blow v7x VMEM, add a K grid axis
    # ("arbitrary") with an f32 accumulator and a pl.when-gated epilogue.
    return out_padded[:batch, :num_classes]


def _reference_forward(i, x, weights, biases, *, regressive=False):
    logits = x.astype(jnp.float32) @ weights[i].astype(jnp.float32).T + biases[i]
    if regressive:
        return jax.nn.sigmoid(logits).astype(x.dtype)
    return jax.nn.softmax(logits, axis=1).astype(x.dtype)


if __name__ == "__main__":
    # Deterministic synthetic parameters / inputs (no checkpoint loading).
    n_source, fdim, num_classes, batch = 3, 32, 16, 8

    key = jax.random.PRNGKey(0)
    kx, kw, kb = jax.random.split(key, 3)

    # PyTorch nn.Linear default init: U(-1/sqrt(fdim), 1/sqrt(fdim))
    bound = 1.0 / jnp.sqrt(jnp.float32(fdim))
    weights = jax.random.uniform(kw, (n_source, num_classes, fdim),
                                 minval=-bound, maxval=bound,
                                 dtype=jnp.float32)
    biases = jax.random.uniform(kb, (n_source, num_classes),
                                minval=-bound, maxval=bound,
                                dtype=jnp.float32)
    x = jax.random.normal(kx, (batch, fdim), dtype=jnp.float32)

    expert_idx = 1

    # Softmax path
    out = experts_forward(expert_idx, x, weights, biases, regressive=False)
    out = jax.block_until_ready(out)
    ref = _reference_forward(expert_idx, x, weights, biases, regressive=False)
    # tolerance relaxed slightly for pl.reciprocal(approx=True)
    if not jnp.allclose(out, ref, atol=2e-3, rtol=2e-3):
        raise AssertionError("Pallas Experts kernel (softmax) mismatch vs JAX reference")

    # Sigmoid (regressive) path
    out_r = experts_forward(expert_idx, x, weights, biases, regressive=True)
    out_r = jax.block_until_ready(out_r)
    ref_r = _reference_forward(expert_idx, x, weights, biases, regressive=True)
    if not jnp.allclose(out_r, ref_r, atol=1e-5, rtol=1e-5):
        raise AssertionError("Pallas Experts kernel (sigmoid) mismatch vs JAX reference")

    print("KERNEL_OK")
</pallas_src>

<mosaic_0001>
module attributes {stable_mosaic.version = 11 : i64} {
  func.func @_experts_kernel(%arg0: i32, %arg1: memref<1xi32, #tpu.memory_space<smem>>, %arg2: memref<128x128xf32, #tpu.memory_space<vmem>>, %arg3: memref<1x128x128xf32, #tpu.memory_space<vmem>>, %arg4: memref<1x1x128xf32, #tpu.memory_space<vmem>>, %arg5: memref<128x128xf32, #tpu.memory_space<vmem>>) attributes {dimension_semantics = [#tpu.dimension_semantics<parallel>], iteration_bounds = array<i64: 1>, scalar_prefetch = 1 : i64, scratch_operands = 0 : i64, tpu.core_type = #tpu.core_type<tc>, window_params = [{transform_indices = @transform_0, window_bounds = array<i64: 128, 128>}, {transform_indices = @transform_1, window_bounds = array<i64: 1, 128, 128>}, {transform_indices = @transform_2, window_bounds = array<i64: 1, 1, 128>}, {transform_indices = @transform_3, window_bounds = array<i64: 128, 128>}]} {
    %c0 = arith.constant 0 : index
    %c0_0 = arith.constant 0 : index
    %0 = vector.load %arg2[%c0, %c0_0] : memref<128x128xf32, #tpu.memory_space<vmem>>, vector<128x128xf32>
    %c0_1 = arith.constant 0 : index
    %c0_2 = arith.constant 0 : index
    %c0_3 = arith.constant 0 : index
    %1 = vector.load %arg3[%c0_1, %c0_2, %c0_3] : memref<1x128x128xf32, #tpu.memory_space<vmem>>, vector<1x128x128xf32>
    %2 = vector.shape_cast %1 : vector<1x128x128xf32> to vector<128x128xf32>
    %c0_4 = arith.constant 0 : index
    %c0_5 = arith.constant 0 : index
    %c0_6 = arith.constant 0 : index
    %3 = vector.load %arg4[%c0_4, %c0_5, %c0_6] : memref<1x1x128xf32, #tpu.memory_space<vmem>>, vector<1x1x128xf32>
    %4 = vector.shape_cast %3 : vector<1x1x128xf32> to vector<1x128xf32>
    %cst = arith.constant dense<0.000000e+00> : vector<128x128xf32>
    %5 = tpu.matmul %0, %2, %cst {dimension_numbers = #tpu.dot_dimension_numbers<[1], [1], [0], [0], [0, 0, 1, 0], [], []>} : vector<128x128xf32>, vector<128x128xf32>, vector<128x128xf32> -> vector<128x128xf32>
    %6 = vector.broadcast %4 : vector<1x128xf32> to vector<128x128xf32>
    %7 = arith.addf %5, %6 : vector<128x128xf32>
    %8 = tpu.iota {dimensions = array<i32: 1>} : vector<128x128xi32>
    %c16_i32 = arith.constant 16 : i32
    %9 = vector.broadcast %c16_i32 : i32 to vector<128x128xi32>
    %10 = arith.cmpi slt, %8, %9 : vector<128x128xi32>
    %cst_7 = arith.constant 0xFF800000 : f32
    %11 = vector.broadcast %cst_7 : f32 to vector<128x128xf32>
    %12 = arith.select %10, %7, %11 : vector<128x128xi1>, vector<128x128xf32>
    %cst_8 = arith.constant dense<0xFF800000> : vector<128xf32>
    %13 = vector.multi_reduction <maximumf>, %12, %cst_8 [1] : vector<128x128xf32> to vector<128xf32>
    %14 = vector.shape_cast %13 : vector<128xf32> to vector<128x1xf32>
    %15 = vector.broadcast %14 : vector<128x1xf32> to vector<128x128xf32>
    %16 = arith.subf %12, %15 : vector<128x128xf32>
    %17 = math.exp %16 : vector<128x128xf32>
    %cst_9 = arith.constant dense<0.000000e+00> : vector<128xf32>
    %18 = vector.multi_reduction <add>, %17, %cst_9 [1] : vector<128x128xf32> to vector<128xf32>
    %19 = vector.shape_cast %18 : vector<128xf32> to vector<128x1xf32>
    %20 = tpu.reciprocal %19 {approx = true} : vector<128x1xf32> -> vector<128x1xf32>
    %21 = vector.broadcast %20 : vector<128x1xf32> to vector<128x128xf32>
    %22 = arith.mulf %17, %21 : vector<128x128xf32>
    %c0_10 = arith.constant 0 : index
    %c0_11 = arith.constant 0 : index
    %23 = vector.load %arg5[%c0_10, %c0_11] : memref<128x128xf32, #tpu.memory_space<vmem>>, vector<128x128xf32>
    tpu.vector_store %arg5[%c0_10, %c0_11], %22 {strides = array<i32>} : memref<128x128xf32, #tpu.memory_space<vmem>>, vector<128x128xf32>,
    return
  }
  func.func @transform_0(%arg0: i32, %arg1: memref<1xi32, #tpu.memory_space<smem>>) -> (i32, i32) {
    %c0_i32 = arith.constant 0 : i32
    %c0_i32_0 = arith.constant 0 : i32
    return %arg0, %c0_i32 : i32, i32
  }
  func.func @transform_1(%arg0: i32, %arg1: memref<1xi32, #tpu.memory_space<smem>>) -> (i32, i32, i32) {
    %c0 = arith.constant 0 : index
    %0 = memref.load %arg1[%c0] : memref<1xi32, #tpu.memory_space<smem>>
    %c0_i32 = arith.constant 0 : i32
    %c0_i32_0 = arith.constant 0 : i32
    %c0_i32_1 = arith.constant 0 : i32
    return %0, %c0_i32, %c0_i32_0 : i32, i32, i32
  }
  func.func @transform_2(%arg0: i32, %arg1: memref<1xi32, #tpu.memory_space<smem>>) -> (i32, i32, i32) {
    %c0 = arith.constant 0 : index
    %0 = memref.load %arg1[%c0] : memref<1xi32, #tpu.memory_space<smem>>
    %c0_i32 = arith.constant 0 : i32
    %c0_i32_0 = arith.constant 0 : i32
    %c0_i32_1 = arith.constant 0 : i32
    return %0, %c0_i32, %c0_i32_0 : i32, i32, i32
  }
  func.func @transform_3(%arg0: i32, %arg1: memref<1xi32, #tpu.memory_space<smem>>) -> (i32, i32) {
    %c0_i32 = arith.constant 0 : i32
    %c0_i32_0 = arith.constant 0 : i32
    return %arg0, %c0_i32 : i32, i32
  }
}

</mosaic_0001>

<bundles_post_ra>
// kernel: tpu_custom_call.1
= control target key start
LH: loop header
LB: loop body
LE: loop exit
PB: predicated region body
PF: predicated region fallthrough
CT: control target
= control target key end

     0   :  { %10 = vsyncpa [#allocation5], 0  ;;  %s908_s0 = inlined_call_operand.<no memory space> [shape: s32[1], index: 0, kind: input, shape index: {}]   ;;  %s909_s1 = inlined_call_operand.hbm [shape: f32[128,128], index: 1, kind: input, shape index: {}]   ;;  %s910_s2 = inlined_call_operand.hbm [shape: f32[3,128,128], index: 2, kind: input, shape index: {}]   ;;  %s911_s3 = inlined_call_operand.vmem [shape: f32[3,1,128], index: 3, kind: input, shape index: {}]   ;;  %s912_s4 = inlined_call_operand.hbm [shape: f32[128,128], index: 4, kind: output, shape index: {}]  }
   0x1   :  { %11 = vsyncpa [#allocation8], 0 }
   0x2   :  { %12 = vsyncpa [#allocation6], 0  ;;  %s711_s15 = smov [#allocation4]   ;;  %s453_s19 = sshll.u32 %s908_s0, 11 }
   0x3   :  { %s18_s16 = sshll.u32 %s711_s15, 4  ;;  %s19_s16 = int_to_ptr.vmem [resolvable:$true] %s18_s16 }
   0x4   :  { %s651_s20 = scalar_lea.vmem %s19_s16, 2048  ;;  %p656_p1 = scmp.lt.s32.totalorder %s19_s16, %s19_s16 }
   0x5   :  { %p652_p0 = scmp.ne.s32.totalorder %s19_s16, %s651_s20  ;;  %p657_p2 = scmp.lt.s32.totalorder %s651_s20, %s651_s20 }
   0x7   :  { %p658_p3 = por %p657_p2, %p656_p1 }
   0x9   :  { %p659_p4 = pnand %p658_p3, %p652_p0 }
   0xb   :  { %662 = shalt.err (!%p659_p4)
}
   0xc   :  { %s712_s21 = smov 128   ;;  %s713_s22 = smov 8  }
   0xd   :  { %24 = dma.hbm_to_vmem [thread:$0]  %s909_s1, 2048, %s19_s16, [#allocation5], %s712_s21, %s712_s21, %s713_s22  }
   0xe   :  { %s33_s27 = scalar_lea.hbm %s910_s2, %s453_s19  ;;  %s714_s28 = smov [#allocation7]  }
   0xf   :  { %s34_s29 = sshll.u32 %s714_s28, 4  ;;  %s663_s30 = scalar_lea.hbm %s33_s27, 2048  ;;  %s35_s29 = int_to_ptr.vmem [resolvable:$true] %s34_s29 }
  0x10   :  { %p664_p5 = scmp.ne.s32.totalorder %s33_s27, %s663_s30  ;;  %s665_s7 = scalar_lea.hbm %s910_s2, 6144 }
  0x11   :  { %p666_p6 = scmp.lt.s32.totalorder %s33_s27, %s910_s2  ;;  %p667_p7 = scmp.lt.s32.totalorder %s665_s7, %s663_s30 }
  0x13   :  { %p668_p8 = por %p667_p7, %p666_p6 }
  0x15   :  { %p669_p9 = pnand %p668_p8, %p664_p5 }
  0x17   :  { %672 = shalt.err (!%p669_p9)
}
  0x18   :  { %s673_s1 = scalar_lea.vmem %s35_s29, 2048  ;;  %p678_p11 = scmp.lt.s32.totalorder %s35_s29, %s35_s29 }
  0x19   :  { %p674_p10 = scmp.ne.s32.totalorder %s35_s29, %s673_s1  ;;  %p679_p12 = scmp.lt.s32.totalorder %s673_s1, %s673_s1 }
  0x1b   :  { %p680_p13 = por %p679_p12, %p678_p11 }
  0x1d   :  { %p681_p0 = pnand %p680_p13, %p674_p10 }
  0x1f   :  { %684 = shalt.err (!%p681_p0)
}
  0x20   :  { %40 = dma.hbm_to_vmem [thread:$0]  %s33_s27, 2048, %s35_s29, [#allocation8], %s712_s21, %s712_s21, %s713_s22  }
  0x21   :  { %705 = dma.done.wait [#allocation5], 2048  }
  0x22   :  { %706 = vsyncadd [#allocation5], 4294965248 }
  0x23   :  { %707 = dma.done.wait [#allocation8], 2048  }
  0x24   :  { %708 = vsyncadd [#allocation8], 4294965248  ;;  %v95_v0 = vld [vmem:[#allocation7 + $0x78] sm:$0xff]  ;;  %v94_v1 = vld [vmem:[#allocation7 + $0x70] sm:$0xff]  ;;  %p60_p1 = scmp.lt.s32.totalorder %s908_s0, 2  ;;  %v248_v32 = vlaneseq }
  0x25   :  { %486 = vmatprep.subr.mxu0 %v95_v0  ;;  %542 = vmatprep.subr.mxu1 %v95_v0  ;;  %v93_v2 = vld [vmem:[#allocation7 + $0x68] sm:$0xff]  ;;  %v64_v3 = vld [vmem:[#allocation4] sm:$0xff]  ;;  %v91_v6 = vld [vmem:[#allocation7 + $0x58] sm:$0xff] }
  0x26   :  { %487 = vmatpush3.xpose.msra.mxu0 %v95_v0  ;;  %558 = vmatpush3.xpose.msra.mxu1 %v95_v0  ;;  %v72_v4 = vld [vmem:[#allocation4 + $0x40] sm:$0xff]  ;;  %v90_v7 = vld [vmem:[#allocation7 + $0x50] sm:$0xff]  ;;  %v89_v8 = vld [vmem:[#allocation7 + $0x48] sm:$0xff]  ;;  %s914_s0 = smov (!%p60_p1, %s908_s0), 2  ;;  %v771_v33 = vand.u32 127, %v248_v32 }
  0x27   :  { %488 = vmatprep.subr.mxu0 %v94_v1  ;;  %543 = vmatprep.subr.mxu1 %v94_v1  ;;  %v92_v5 = vld [vmem:[#allocation7 + $0x60] sm:$0xff]  ;;  %v87_v10 = vld [vmem:[#allocation7 + $0x38] sm:$0xff]  ;;  %v86_v11 = vld [vmem:[#allocation7 + $0x30] sm:$0xff]  ;;  %s62_s15 = scalar_lea.vmem %s911_s3, %s914_s0  ;;  %s715_s0 = smov [#allocation9]  }
  0x28   :  { %518 = vmatprep.mubr.f32.mxu0 %v64_v3  ;;  %530 = vmatprep.mubr.f32.mxu1 %v72_v4  ;;  %v88_v9 = vld [vmem:[#allocation7 + $0x40] sm:$0xff]  ;;  %v85_v12 = vld [vmem:[#allocation7 + $0x28] sm:$0xff]  ;;  %v83_v14 = vld [vmem:[#allocation7 + $0x18] sm:$0xff]  ;;  %vm250_vm0 = vcmp.lt.s32.totalorder %v771_v33, 16  ;;  %s432_s3 = sshll.u32 %s715_s0, 4  ;;  %s433_s3 = int_to_ptr.vmem [resolvable:$true] %s432_s3 }
  0x29   :  { %v84_v13 = vld [vmem:[#allocation7 + $0x20] sm:$0xff]  ;;  %v82_v15 = vld [vmem:[#allocation7 + $0x10] sm:$0xff]  ;;  %v81_v16 = vld [vmem:[#allocation7 + $0x8] sm:$0xff]  ;;  %s685_s16 = scalar_lea.vmem %s433_s3, 2048  ;;  %p690_p3 = scmp.lt.s32.totalorder %s433_s3, %s433_s3 }
  0x2a   :  { %489 = vmatpush3.xpose.msra.mxu0 %v94_v1  ;;  %559 = vmatpush3.xpose.msra.mxu1 %v94_v1  ;;  %v80_v17 = vld [vmem:[#allocation7] sm:$0xff]  ;;  %v65_v18 = vld [vmem:[#allocation4 + $0x8] sm:$0xff]  ;;  %v66_v20 = vld [vmem:[#allocation4 + $0x10] sm:$0xff]  ;;  %p686_p2 = scmp.ne.s32.totalorder %s433_s3, %s685_s16  ;;  %p691_p4 = scmp.lt.s32.totalorder %s685_s16, %s685_s16 }
  0x2b   :  { %490 = vmatprep.subr.mxu0 %v93_v2  ;;  %544 = vmatprep.subr.mxu1 %v93_v2  ;;  %v73_v19 = vld [vmem:[#allocation4 + $0x48] sm:$0xff]  ;;  %v74_v21 = vld [vmem:[#allocation4 + $0x50] sm:$0xff]  ;;  %v67_v22 = vld [vmem:[#allocation4 + $0x18] sm:$0xff] }
  0x2c   :  { %v75_v23 = vld [vmem:[#allocation4 + $0x58] sm:$0xff]  ;;  %v68_v24 = vld [vmem:[#allocation4 + $0x20] sm:$0xff]  ;;  %v69_v26 = vld [vmem:[#allocation4 + $0x28] sm:$0xff]  ;;  %p692_p5 = por %p691_p4, %p690_p3 }
  0x2d   :  { %v76_v25 = vld [vmem:[#allocation4 + $0x60] sm:$0xff]  ;;  %v77_v27 = vld [vmem:[#allocation4 + $0x68] sm:$0xff]  ;;  %v70_v28 = vld [vmem:[#allocation4 + $0x30] sm:$0xff] }
  0x2e   :  { %491 = vmatpush3.xpose.msra.mxu0 %v93_v2  ;;  %560 = vmatpush3.xpose.msra.mxu1 %v93_v2  ;;  %v78_v29 = vld [vmem:[#allocation4 + $0x70] sm:$0xff]  ;;  %v71_v30 = vld [vmem:[#allocation4 + $0x38] sm:$0xff]  ;;  %v452_v34 = vld [vmem:[%s62_s15] ss:$0 sm:$0xff]  ;;  %p693_p6 = pnand %p692_p5, %p686_p2 }
  0x2f   :  { %492 = vmatprep.subr.mxu0 %v92_v5  ;;  %545 = vmatprep.subr.mxu1 %v92_v5  ;;  %v79_v31 = vld [vmem:[#allocation4 + $0x78] sm:$0xff] }
  0x32   :  { %493 = vmatpush3.xpose.msra.mxu0 %v92_v5  ;;  %561 = vmatpush3.xpose.msra.mxu1 %v92_v5 }
  0x33   :  { %494 = vmatprep.subr.mxu0 %v91_v6  ;;  %546 = vmatprep.subr.mxu1 %v91_v6 }
  0x36   :  { %495 = vmatpush3.xpose.msra.mxu0 %v91_v6  ;;  %562 = vmatpush3.xpose.msra.mxu1 %v91_v6 }
  0x37   :  { %496 = vmatprep.subr.mxu0 %v90_v7  ;;  %547 = vmatprep.subr.mxu1 %v90_v7 }
  0x3a   :  { %497 = vmatpush3.xpose.msra.mxu0 %v90_v7  ;;  %563 = vmatpush3.xpose.msra.mxu1 %v90_v7 }
  0x3b   :  { %498 = vmatprep.subr.mxu0 %v89_v8  ;;  %548 = vmatprep.subr.mxu1 %v89_v8 }
  0x3e   :  { %499 = vmatpush3.xpose.msra.mxu0 %v89_v8  ;;  %564 = vmatpush3.xpose.msra.mxu1 %v89_v8 }
  0x3f   :  { %500 = vmatprep.subr.mxu0 %v88_v9  ;;  %549 = vmatprep.subr.mxu1 %v88_v9 }
  0x42   :  { %501 = vmatpush3.xpose.msra.mxu0 %v88_v9  ;;  %565 = vmatpush3.xpose.msra.mxu1 %v88_v9 }
  0x43   :  { %502 = vmatprep.subr.mxu0 %v87_v10  ;;  %550 = vmatprep.subr.mxu1 %v87_v10 }
  0x46   :  { %503 = vmatpush3.xpose.msra.mxu0 %v87_v10  ;;  %566 = vmatpush3.xpose.msra.mxu1 %v87_v10 }
  0x47   :  { %504 = vmatprep.subr.mxu0 %v86_v11  ;;  %551 = vmatprep.subr.mxu1 %v86_v11 }
  0x4a   :  { %505 = vmatpush3.xpose.msra.mxu0 %v86_v11  ;;  %567 = vmatpush3.xpose.msra.mxu1 %v86_v11 }
  0x4b   :  { %506 = vmatprep.subr.mxu0 %v85_v12  ;;  %552 = vmatprep.subr.mxu1 %v85_v12 }
  0x4e   :  { %507 = vmatpush3.xpose.msra.mxu0 %v85_v12  ;;  %568 = vmatpush3.xpose.msra.mxu1 %v85_v12 }
  0x4f   :  { %508 = vmatprep.subr.mxu0 %v84_v13  ;;  %553 = vmatprep.subr.mxu1 %v84_v13 }
  0x52   :  { %509 = vmatpush3.xpose.msra.mxu0 %v84_v13  ;;  %569 = vmatpush3.xpose.msra.mxu1 %v84_v13 }
  0x53   :  { %510 = vmatprep.subr.mxu0 %v83_v14  ;;  %554 = vmatprep.subr.mxu1 %v83_v14 }
  0x56   :  { %511 = vmatpush3.xpose.msra.mxu0 %v83_v14  ;;  %570 = vmatpush3.xpose.msra.mxu1 %v83_v14 }
  0x57   :  { %512 = vmatprep.subr.mxu0 %v82_v15  ;;  %555 = vmatprep.subr.mxu1 %v82_v15 }
  0x5a   :  { %513 = vmatpush3.xpose.msra.mxu0 %v82_v15  ;;  %571 = vmatpush3.xpose.msra.mxu1 %v82_v15 }
  0x5b   :  { %514 = vmatprep.subr.mxu0 %v81_v16  ;;  %556 = vmatprep.subr.mxu1 %v81_v16 }
  0x5e   :  { %515 = vmatpush3.xpose.msra.mxu0 %v81_v16  ;;  %572 = vmatpush3.xpose.msra.mxu1 %v81_v16 }
  0x5f   :  { %516 = vmatprep.subr.mxu0 %v80_v17  ;;  %557 = vmatprep.subr.mxu1 %v80_v17 }
  0x62   :  { %517 = vmatpush3.xpose.msra.mxu0 %v80_v17  ;;  %573 = vmatpush3.xpose.msra.mxu1 %v80_v17 }
  0x65   :  { %519 = vmatmul.mubr.f32.vlgmr.msra.gmra.mxu0 %v65_v18  ;;  %531 = vmatmul.mubr.f32.vlgmr.msra.gmra.mxu1 %v73_v19 }
  0x66   :  { %521 = vmatprep.mubr.f32.mxu0 %v66_v20  ;;  %533 = vmatprep.mubr.f32.mxu1 %v74_v21 }
  0x69   :  { %522 = vmatmul.mubr.f32.gmra.mxu0 %v67_v22  ;;  %534 = vmatmul.mubr.f32.gmra.mxu1 %v75_v23 }
  0x6a   :  { %524 = vmatprep.mubr.f32.mxu0 %v68_v24  ;;  %536 = vmatprep.mubr.f32.mxu1 %v76_v25 }
  0x6d   :  { %525 = vmatmul.mubr.f32.gmra.mxu0 %v69_v26  ;;  %537 = vmatmul.mubr.f32.gmra.mxu1 %v77_v27 }
  0x6e   :  { %527 = vmatprep.mubr.f32.mxu0 %v70_v28  ;;  %539 = vmatprep.mubr.f32.mxu1 %v78_v29 }
  0x71   :  { %528 = vmatmul.mubr.f32.gmra.mxu0 %v71_v30  ;;  %540 = vmatmul.mubr.f32.gmra.mxu1 %v79_v31 }
 0x125   :  { %v520_v35 = vpop.f32.mrf.mxu0  ;;  %v532_v36 = vpop.f32.mrf.mxu1 }
 0x126   :  { %v175_v37 = vadd.f32 %v520_v35, %v452_v34  ;;  %v215_v38 = vadd.f32 %v532_v36, %v452_v34 }
 0x127   :  { %v169_v39 = vpop.f32.mrf.mxu0  ;;  %v209_v40 = vpop.f32.mrf.mxu1 }
 0x128   :  { %v170_v41 = vadd.f32 %v452_v34, %v169_v39  ;;  %v776_v42 = vsel %vm250_vm0, %v215_v38, -inf  ;;  %v252_v43 = vsel %vm250_vm0, %v175_v37, -inf  ;;  %v210_v49 = vadd.f32 %v452_v34, %v209_v40 }
 0x129   :  { %285 = vmax.xlane.f32.xlu1 %v776_v42  ;;  %269 = vmax.xlane.f32.xlu0 %v252_v43  ;;  %v523_v44 = vpop.f32.mrf.mxu0  ;;  %v535_v45 = vpop.f32.mrf.mxu1 }
 0x12a   :  { %v185_v46 = vadd.f32 %v523_v44, %v452_v34  ;;  %v225_v47 = vadd.f32 %v535_v45, %v452_v34  ;;  %v251_v51 = vsel %vm250_vm0, %v170_v41, -inf  ;;  %v259_v59 = vsel %vm250_vm0, %v210_v49, -inf }
 0x12b   :  { %v179_v48 = vpop.f32.mrf.mxu0  ;;  %v219_v52 = vpop.f32.mrf.mxu1 }
 0x12c   :  { %v254_v50 = vsel %vm250_vm0, %v185_v46, -inf  ;;  %v787_v54 = vsel %vm250_vm0, %v225_v47, -inf  ;;  %v180_v57 = vadd.f32 %v452_v34, %v179_v48  ;;  %v220_v58 = vadd.f32 %v452_v34, %v219_v52 }
 0x12d   :  { %273 = vmax.xlane.f32.xlu1 %v254_v50  ;;  %267 = vmax.xlane.f32.xlu0 %v251_v51  ;;  %v526_v53 = vpop.f32.mrf.mxu0  ;;  %v538_v56 = vpop.f32.mrf.mxu1 }
 0x12e   :  { %v195_v60 = vadd.f32 %v526_v53, %v452_v34  ;;  %v253_v0 = vsel %vm250_vm0, %v180_v57, -inf  ;;  %v261_v1 = vsel %vm250_vm0, %v220_v58, -inf  ;;  %v235_v2 = vadd.f32 %v538_v56, %v452_v34 }
 0x12f   :  { %v189_v55 = vpop.f32.mrf.mxu0  ;;  %v229_v62 = vpop.f32.mrf.mxu1 }
 0x130   :  { %v190_v61 = vadd.f32 %v452_v34, %v189_v55  ;;  %v230_v3 = vadd.f32 %v452_v34, %v229_v62  ;;  %v256_v4 = vsel %vm250_vm0, %v195_v60, -inf  ;;  %v264_v10 = vsel %vm250_vm0, %v235_v2, -inf }
 0x131   :  { %289 = vmax.xlane.f32.xlu1 %v787_v54  ;;  %283 = vmax.xlane.f32.xlu0 %v259_v59  ;;  %v529_v63 = vpop.f32.mrf.mxu0  ;;  %v541_v7 = vpop.f32.mrf.mxu1 }
 0x132   :  { %v800_v5 = vsel %vm250_vm0, %v190_v61, -inf  ;;  %v205_v8 = vadd.f32 %v529_v63, %v452_v34  ;;  %v807_v11 = vsel %vm250_vm0, %v230_v3, -inf  ;;  %v245_v13 = vadd.f32 %v541_v7, %v452_v34 }
 0x133   :  { %v199_v6 = vpop.f32.mrf.mxu0  ;;  %v239_v12 = vpop.f32.mrf.mxu1 }
 0x134   :  { %v200_v9 = vadd.f32 %v452_v34, %v199_v6  ;;  %v240_v14 = vadd.f32 %v452_v34, %v239_v12  ;;  %v812_v15 = vsel %vm250_vm0, %v205_v8, -inf  ;;  %v822_v17 = vsel %vm250_vm0, %v245_v13, -inf }
 0x135   :  { %271 = vmax.xlane.f32.xlu1 %v253_v0  ;;  %287 = vmax.xlane.f32.xlu0 %v261_v1 }
 0x136   :  { %v816_v16 = vsel %vm250_vm0, %v200_v9, -inf  ;;  %v826_v18 = vsel %vm250_vm0, %v240_v14, -inf }
 0x139   :  { %277 = vmax.xlane.f32.xlu1 %v256_v4  ;;  %275 = vmax.xlane.f32.xlu0 %v800_v5 }
 0x13d   :  { %293 = vmax.xlane.f32.xlu1 %v264_v10  ;;  %291 = vmax.xlane.f32.xlu0 %v807_v11 }
 0x141   :  { %281 = vmax.xlane.f32.xlu1 %v812_v15  ;;  %279 = vmax.xlane.f32.xlu0 %v816_v16 }
 0x145   :  { %297 = vmax.xlane.f32.xlu1 %v822_v17  ;;  %295 = vmax.xlane.f32.xlu0 %v826_v18 }
 0x1b2   :  { %v286_v19 = vpop.xlane.xlu1 %285  ;;  %v270_v20 = vpop.xlane.xlu0 %269 }
 0x1b3   :  { %v308_v21 = vsub.f32 %v776_v42, %v286_v19  ;;  %v300_v22 = vsub.f32 %v252_v43, %v270_v20 }
 0x1b5   :  { %v317_v23 = vmul.f32 1.442695, %v300_v22  ;;  %v333_v26 = vmul.f32 1.442695, %v308_v21 }
 0x1b6   :  { %v274_v24 = vpop.xlane.xlu1 %273  ;;  %v268_v25 = vpop.xlane.xlu0 %267 }
 0x1b7   :  { %v302_v27 = vsub.f32 %v254_v50, %v274_v24  ;;  %v299_v28 = vsub.f32 %v251_v51, %v268_v25  ;;  %579 = vpow2.f32 %v317_v23 }
 0x1b8   :  { %581 = vpow2.f32 %v333_v26 }
 0x1b9   :  { %v315_v29 = vmul.f32 1.442695, %v299_v28  ;;  %v321_v32 = vmul.f32 1.442695, %v302_v27 }
 0x1ba   :  { %v290_v30 = vpop.xlane.xlu1 %289  ;;  %v284_v31 = vpop.xlane.xlu0 %283 }
 0x1bb   :  { %v307_v33 = vsub.f32 %v259_v59, %v284_v31  ;;  %583 = vpow2.f32 %v315_v29  ;;  %v310_v34 = vsub.f32 %v787_v54, %v290_v30 }
 0x1bc   :  { %585 = vpow2.f32 %v321_v32 }
 0x1bd   :  { %v331_v35 = vmul.f32 1.442695, %v307_v33  ;;  %v337_v39 = vmul.f32 1.442695, %v310_v34 }
 0x1be   :  { %v272_v36 = vpop.xlane.xlu1 %271  ;;  %v288_v37 = vpop.xlane.xlu0 %287 }
 0x1bf   :  { %v301_v38 = vsub.f32 %v253_v0, %v272_v36  ;;  %587 = vpow2.f32 %v331_v35  ;;  %v309_v40 = vsub.f32 %v261_v1, %v288_v37 }
 0x1c1   :  { %v319_v41 = vmul.f32 1.442695, %v301_v38  ;;  %v335_v45 = vmul.f32 1.442695, %v309_v40 }
 0x1c2   :  { %v278_v42 = vpop.xlane.xlu1 %277  ;;  %v276_v43 = vpop.xlane.xlu0 %275 }
 0x1c3   :  { %589 = vpow2.f32 %v319_v41  ;;  %v304_v44 = vsub.f32 %v256_v4, %v278_v42  ;;  %v303_v46 = vsub.f32 %v800_v5, %v276_v43 }
 0x1c4   :  { %591 = vpow2.f32 %v337_v39  ;;  %v833_v47 = vpop.eup %579 }
 0x1c5   :  { %v325_v48 = vmul.f32 1.442695, %v304_v44  ;;  %349 = vadd.xlane.f32.xlu1 %v833_v47  ;;  %v836_v52 = vpop.eup %581  ;;  %v323_v53 = vmul.f32 1.442695, %v303_v46 }
 0x1c6   :  { %v294_v49 = vpop.xlane.xlu1 %293  ;;  %v292_v50 = vpop.xlane.xlu0 %291 }
 0x1c7   :  { %593 = vpow2.f32 %v325_v48  ;;  %v312_v51 = vsub.f32 %v264_v10, %v294_v49  ;;  %v311_v54 = vsub.f32 %v807_v11, %v292_v50 }
 0x1c8   :  { %595 = vpow2.f32 %v335_v45  ;;  %v839_v55 = vpop.eup %583 }
 0x1c9   :  { %v341_v56 = vmul.f32 1.442695, %v312_v51  ;;  %365 = vadd.xlane.f32.xlu1 %v836_v52  ;;  %347 = vadd.xlane.f32.xlu0 %v839_v55  ;;  %v844_v60 = vpop.eup %585  ;;  %v339_v61 = vmul.f32 1.442695, %v311_v54 }
 0x1ca   :  { %v282_v57 = vpop.xlane.xlu1 %281  ;;  %v280_v58 = vpop.xlane.xlu0 %279 }
 0x1cb   :  { %597 = vpow2.f32 %v341_v56  ;;  %v306_v59 = vsub.f32 %v812_v15, %v282_v57  ;;  %v305_v62 = vsub.f32 %v816_v16, %v280_v58 }
 0x1cc   :  { %599 = vpow2.f32 %v323_v53  ;;  %v847_v63 = vpop.eup %587 }
 0x1cd   :  { %v329_v0 = vmul.f32 1.442695, %v306_v59  ;;  %353 = vadd.xlane.f32.xlu1 %v844_v60  ;;  %363 = vadd.xlane.f32.xlu0 %v847_v63  ;;  %v327_v5 = vmul.f32 1.442695, %v305_v62 }
 0x1ce   :  { %v298_v1 = vpop.xlane.xlu1 %297  ;;  %v296_v2 = vpop.xlane.xlu0 %295 }
 0x1cf   :  { %601 = vpow2.f32 %v329_v0  ;;  %v314_v3 = vsub.f32 %v822_v17, %v298_v1  ;;  %v313_v6 = vsub.f32 %v826_v18, %v296_v2 }
 0x1d0   :  { %v852_v4 = vpop.eup %589  ;;  %603 = vpow2.f32 %v339_v61 }
 0x1d1   :  { %v855_v7 = vpop.eup %591  ;;  %v345_v8 = vmul.f32 1.442695, %v314_v3  ;;  %351 = vadd.xlane.f32.xlu0 %v852_v4  ;;  %v343_v10 = vmul.f32 1.442695, %v313_v6 }
 0x1d2   :  { %369 = vadd.xlane.f32.xlu1 %v855_v7 }
 0x1d3   :  { %605 = vpow2.f32 %v345_v8 }
 0x1d4   :  { %v859_v9 = vpop.eup %593  ;;  %607 = vpow2.f32 %v327_v5 }
 0x1d5   :  { %v861_v11 = vpop.eup %595  ;;  %609 = vpow2.f32 %v343_v10 }
 0x1d6   :  { %357 = vadd.xlane.f32.xlu1 %v859_v9  ;;  %367 = vadd.xlane.f32.xlu0 %v861_v11 }
 0x1d8   :  { %v865_v12 = vpop.eup %597 }
 0x1d9   :  { %v867_v13 = vpop.eup %599 }
 0x1da   :  { %373 = vadd.xlane.f32.xlu1 %v865_v12  ;;  %355 = vadd.xlane.f32.xlu0 %v867_v13 }
 0x1dc   :  { %v871_v14 = vpop.eup %601 }
 0x1dd   :  { %v873_v15 = vpop.eup %603 }
 0x1de   :  { %361 = vadd.xlane.f32.xlu1 %v871_v14  ;;  %371 = vadd.xlane.f32.xlu0 %v873_v15 }
 0x1e0   :  { %v877_v16 = vpop.eup %605 }
 0x1e1   :  { %v879_v17 = vpop.eup %607 }
 0x1e2   :  { %377 = vadd.xlane.f32.xlu1 %v877_v16  ;;  %359 = vadd.xlane.f32.xlu0 %v879_v17  ;;  %v883_v18 = vpop.eup %609 }
 0x1e6   :  { %375 = vadd.xlane.f32.xlu0 %v883_v18 }
 0x24e   :  { %v350_v19 = vpop.xlane.xlu1 %349 }
 0x24f   :  { %611 = vrcp.f32 %v350_v19 }
 0x252   :  { %v366_v20 = vpop.xlane.xlu1 %365  ;;  %v348_v21 = vpop.xlane.xlu0 %347 }
 0x253   :  { %613 = vrcp.f32 %v366_v20 }
 0x254   :  { %615 = vrcp.f32 %v348_v21 }
 0x256   :  { %v354_v22 = vpop.xlane.xlu1 %353  ;;  %v364_v23 = vpop.xlane.xlu0 %363 }
 0x257   :  { %617 = vrcp.f32 %v354_v22 }
 0x258   :  { %619 = vrcp.f32 %v364_v23 }
 0x25a   :  { %v352_v25 = vpop.xlane.xlu0 %351 }
 0x25b   :  { %v370_v24 = vpop.xlane.xlu1 %369 }
 0x25c   :  { %621 = vrcp.f32 %v370_v24  ;;  %v612_v26 = vpop.eup %611 }
 0x25d   :  { %623 = vrcp.f32 %v352_v25  ;;  %v396_v27 = vmul.f32 %v612_v26, %v833_v47 }
 0x25f   :  { %v358_v28 = vpop.xlane.xlu1 %357  ;;  %v368_v29 = vpop.xlane.xlu0 %367  ;;  %412 = vst [vmem:[#allocation9 + $0x8] sm:$0xff] %v396_v27 }
 0x260   :  { %625 = vrcp.f32 %v358_v28  ;;  %v614_v30 = vpop.eup %613 }
 0x261   :  { %627 = vrcp.f32 %v368_v29  ;;  %v616_v31 = vpop.eup %615  ;;  %v404_v32 = vmul.f32 %v614_v30, %v836_v52 }
 0x262   :  { %v395_v33 = vmul.f32 %v616_v31, %v839_v55 }
 0x263   :  { %v374_v34 = vpop.xlane.xlu1 %373  ;;  %v356_v35 = vpop.xlane.xlu0 %355  ;;  %420 = vst [vmem:[#allocation9 + $0x48] sm:$0xff] %v404_v32 }
 0x264   :  { %629 = vrcp.f32 %v374_v34  ;;  %v618_v36 = vpop.eup %617  ;;  %411 = vst [vmem:[#allocation9] sm:$0xff] %v395_v33 }
 0x265   :  { %631 = vrcp.f32 %v356_v35  ;;  %v620_v37 = vpop.eup %619  ;;  %v398_v38 = vmul.f32 %v618_v36, %v844_v60 }
 0x266   :  { %v403_v39 = vmul.f32 %v620_v37, %v847_v63 }
 0x267   :  { %v362_v40 = vpop.xlane.xlu1 %361  ;;  %v372_v41 = vpop.xlane.xlu0 %371  ;;  %414 = vst [vmem:[#allocation9 + $0x18] sm:$0xff] %v398_v38 }
 0x268   :  { %633 = vrcp.f32 %v362_v40  ;;  %419 = vst [vmem:[#allocation9 + $0x40] sm:$0xff] %v403_v39 }
 0x269   :  { %v622_v42 = vpop.eup %621  ;;  %635 = vrcp.f32 %v372_v41 }
 0x26a   :  { %v624_v43 = vpop.eup %623  ;;  %v406_v44 = vmul.f32 %v622_v42, %v855_v7 }
 0x26b   :  { %v397_v45 = vmul.f32 %v624_v43, %v852_v4  ;;  %v378_v46 = vpop.xlane.xlu1 %377  ;;  %v360_v47 = vpop.xlane.xlu0 %359 }
 0x26c   :  { %422 = vst [vmem:[#allocation9 + $0x58] sm:$0xff] %v406_v44  ;;  %637 = vrcp.f32 %v378_v46 }
 0x26d   :  { %v626_v48 = vpop.eup %625  ;;  %413 = vst [vmem:[#allocation9 + $0x10] sm:$0xff] %v397_v45  ;;  %639 = vrcp.f32 %v360_v47 }
 0x26e   :  { %v628_v49 = vpop.eup %627  ;;  %v400_v50 = vmul.f32 %v626_v48, %v859_v9 }
 0x26f   :  { %v405_v51 = vmul.f32 %v628_v49, %v861_v11  ;;  %v376_v52 = vpop.xlane.xlu0 %375 }
 0x270   :  { %416 = vst [vmem:[#allocation9 + $0x28] sm:$0xff] %v400_v50  ;;  %641 = vrcp.f32 %v376_v52 }
 0x271   :  { %v630_v53 = vpop.eup %629  ;;  %421 = vst [vmem:[#allocation9 + $0x50] sm:$0xff] %v405_v51 }
 0x272   :  { %v632_v54 = vpop.eup %631  ;;  %v408_v55 = vmul.f32 %v630_v53, %v865_v12 }
 0x273   :  { %v399_v56 = vmul.f32 %v632_v54, %v867_v13 }
 0x274   :  { %424 = vst [vmem:[#allocation9 + $0x68] sm:$0xff] %v408_v55 }
 0x275   :  { %v634_v57 = vpop.eup %633  ;;  %415 = vst [vmem:[#allocation9 + $0x20] sm:$0xff] %v399_v56 }
 0x276   :  { %v636_v58 = vpop.eup %635  ;;  %v402_v59 = vmul.f32 %v634_v57, %v871_v14 }
 0x277   :  { %v407_v60 = vmul.f32 %v636_v58, %v873_v15 }
 0x278   :  { %418 = vst [vmem:[#allocation9 + $0x38] sm:$0xff] %v402_v59 }
 0x279   :  { %v638_v61 = vpop.eup %637  ;;  %423 = vst [vmem:[#allocation9 + $0x60] sm:$0xff] %v407_v60 }
 0x27a   :  { %v640_v62 = vpop.eup %639  ;;  %v410_v63 = vmul.f32 %v638_v61, %v877_v16 }
 0x27b   :  { %v401_v0 = vmul.f32 %v640_v62, %v879_v17 }
 0x27c   :  { %426 = vst [vmem:[#allocation9 + $0x78] sm:$0xff] %v410_v63 }
 0x27d   :  { %v642_v1 = vpop.eup %641  ;;  %417 = vst [vmem:[#allocation9 + $0x30] sm:$0xff] %v401_v0 }
 0x27e   :  { %v409_v2 = vmul.f32 %v642_v1, %v883_v18 }
 0x280   :  { %425 = vst [vmem:[#allocation9 + $0x70] sm:$0xff] %v409_v2 }
 0x281   :  { %696 = shalt.err (!%p693_p6)
}
 0x282   :  { %438 = dma.vmem_to_hbm [thread:$0]  %s433_s3, 2048, %s912_s4, [#allocation6], %s712_s21, %s712_s21, %s713_s22  }
 0x283   :  { %709 = dma.done.wait [#allocation6], 2048  }
 0x284   :  { %710 = vsyncadd [#allocation6], 4294965248 }
 0x285   :  { %442 = vsyncpa [#allocation5], 1 }
 0x286   :  { %443 = vsyncpa [#allocation8], 1 }
 0x287   :  { %444 = vsyncpa [#allocation6], 1 }

</bundles_post_ra>
